<compile_context>
chip_gen: v5e
topology: v5e:2x2
jax: 0.10.0
libtpu: 0.0.40
codegen_flags: <defaults>
</compile_context>

<pallas_src>
import functools

import jax
import jax.numpy as jnp
from jax import lax
from jax.experimental import pallas as pl
from jax.experimental.pallas import tpu as pltpu

_EPS = 1e-8


def _round_up(x, m):
    return ((x + m - 1) // m) * m


# -----------------------------------------------------------------------------
# Kernel
# -----------------------------------------------------------------------------
def _style_similarity_kernel(c1_ref, c2_ref, p1_ref, p2_ref, out_ref, acc_ref,
                             *, n_rows, tile_rows, nb_per_core, counter_loss,
                             need_mask):
    c = pl.program_id(0)   # TensorCore shard (parallel axis)
    i = pl.program_id(1)   # row-block within the shard (arbitrary / reduction)

    @pl.when(i == 0)
    def _init():
        acc_ref[...] = jnp.zeros_like(acc_ref)

    # Native-dtype DMA (bf16 halves HBM traffic); cast per-tile to f32.
    c1 = c1_ref[...].astype(jnp.float32)
    c2 = c2_ref[...].astype(jnp.float32)
    p1 = p1_ref[...].astype(jnp.float32)
    p2 = p2_ref[...].astype(jnp.float32)

    def sq_norm(x):
        return jnp.sum(x * x, axis=-1, keepdims=True)

    def row_dot(a, b):
        return jnp.sum(a * b, axis=-1, keepdims=True)

    # Squared norms hoisted: one lane-reduce per tensor, shared by every term.
    nc1, nc2, np1, np2 = sq_norm(c1), sq_norm(c2), sq_norm(p1), sq_norm(p2)

    def cosine(a, b, na2, nb2):
        # torch F.cosine_similarity: dot / max(||a||*||b||, eps)
        #   == dot * rsqrt(max(||a||^2 * ||b||^2, eps^2))      (EUP rsqrt)
        return row_dot(a, b) * lax.rsqrt(jnp.maximum(na2 * nb2, _EPS * _EPS))

    # loss = 1 + sum_rows(-cos11 - cos22 [+ 0.5*(cos12 + cos21)]) / (2N)
    contrib = -cosine(c1, p1, nc1, np1) - cosine(c2, p2, nc2, np2)
    if counter_loss:
        contrib = contrib + 0.5 * (cosine(c1, p2, nc1, np2)
                                   + cosine(c2, p1, nc2, np1))

    if need_mask:
        # Ragged last tile / clamped duplicate tile: zero the invalid rows
        # (jnp.where also swallows any NaN/Inf from undefined padding rows).
        start = (c * nb_per_core + i) * tile_rows
        rows = start + lax.broadcasted_iota(jnp.int32, contrib.shape, 0)
        contrib = jnp.where(rows < n_rows, contrib, 0.0)

    # Per-row VMEM accumulator: no per-step XLU reduce-to-scalar, no SMEM RMW.
    acc_ref[...] += contrib

    @pl.when(i == pl.num_programs(1) - 1)
    def _finalize():
        partial = jnp.sum(acc_ref[...])              # single reduce per core
        out_ref[...] = jnp.broadcast_to(partial, out_ref.shape)


# -----------------------------------------------------------------------------
# Wrapper
# -----------------------------------------------------------------------------
def _pick_tile_rows(n, per_row_bytes, tile_rows):
    """Row tile sized by a bytes-per-grid-step target within the VMEM budget."""
    try:
        vmem_cap = int(pltpu.get_tpu_info().vmem_capacity_bytes)
    except Exception:  # pragma: no cover - conservative fallback (v7x per-TC)
        vmem_cap = 64 * 1024 * 1024
    small_vmem = vmem_cap <= (64 << 20)
    # Total double-buffered input footprint target per step:
    #   ~32 MiB on 64 MiB-VMEM chips (v7x), ~64 MiB on 128 MiB chips (v5e/v6e).
    block_budget = (32 << 20) if small_vmem else (64 << 20)
    tm = block_budget // max(per_row_bytes, 1)
    if tile_rows is not None:
        tm = int(tile_rows)
    tm = min(tm, _round_up(n, 8))
    tm = max(8, (tm // 8) * 8)                  # sublane alignment
    vmem_ceiling = (48 << 20) if small_vmem else (100 << 20)   # headroom
    return tm, vmem_ceiling


def _pallas_loss(c1f, c2f, p1f, p2f, counter_loss, tile_rows):
    n, h = c1f.shape
    h_lanes = _round_up(h, 128)                 # lane-padded VMEM footprint
    itemsizes = [jnp.dtype(x.dtype).itemsize for x in (c1f, c2f, p1f, p2f)]
    # 4 double-buffered native-dtype input streams + lane-padded f32 accumulator.
    per_row_bytes = sum(2 * h_lanes * s for s in itemsizes) + 128 * 4

    tm, vmem_ceiling = _pick_tile_rows(n, per_row_bytes, tile_rows)

    nb_total = pl.cdiv(n, tm)                   # NO jnp.pad: cdiv grid + mask
    num_cores = 2 if nb_total >= 2 else 1       # row split across TCs (v7x)
    nb_per_core = pl.cdiv(nb_total, num_cores)
    need_mask = (nb_total * tm != n) or (num_cores * nb_per_core != nb_total)

    def in_map(c, i):
        # Clamp so an over-covering (c, i) re-reads a valid block; the kernel
        # masks all of its rows, so the duplicate contributes exactly zero.
        return (jnp.minimum(c * nb_per_core + i, nb_total - 1), 0)

    kernel = functools.partial(
        _style_similarity_kernel, n_rows=n, tile_rows=tm,
        nb_per_core=nb_per_core, counter_loss=counter_loss,
        need_mask=need_mask)

    vmem_need = tm * per_row_bytes + (4 << 20)
    vmem_limit = int(min(max(vmem_need, 16 << 20), vmem_ceiling))

    pairs = 4 if counter_loss else 2
    bytes_in = sum(int(n) * int(h) * s for s in itemsizes)
    cost = pl.CostEstimate(
        flops=int(n * h * 2 * (4 + pairs)),
        transcendentals=int(pairs * n),
        bytes_accessed=int(bytes_in + num_cores * 8 * 128 * 4),
    )

    out = pl.pallas_call(
        kernel,
        out_shape=jax.ShapeDtypeStruct((num_cores, 8, 128), jnp.float32),
        grid_spec=pltpu.PrefetchScalarGridSpec(
            num_scalar_prefetch=0,
            grid=(num_cores, nb_per_core),
            in_specs=[pl.BlockSpec((tm, h), in_map)] * 4,
            out_specs=pl.BlockSpec((1, 8, 128), lambda c, i: (c, 0, 0)),
            scratch_shapes=[pltpu.VMEM((tm, 1), jnp.float32)],
        ),
        compiler_params=pltpu.CompilerParams(
            dimension_semantics=("parallel", "arbitrary"),
            vmem_limit_bytes=vmem_limit,
        ),
        cost_estimate=cost,
    )(c1f, c2f, p1f, p2f)

    total = jnp.sum(out[:, 0, 0])               # tiny cross-core combine
    return 1.0 + total / (2.0 * float(n))


def loss_style_similarity(context_1_style, context_2_style,
                          par_1_style, par_2_style,
                          counter_loss=False, *, tile_rows=None,
                          use_pallas=None):
    """JAX/Pallas equivalent of LossStyleSimilarityModule.forward.

    Returns (loss, acc) scalars with acc == loss * 0.
    """
    unwrap = lambda x: x[1] if isinstance(x, tuple) else x
    c1, c2, p1, p2 = (unwrap(x) for x in (context_1_style, context_2_style,
                                          par_1_style, par_2_style))

    h = c1.shape[-1]
    # Native dtypes all the way into the kernel (no wrapper astype copies).
    flat = lambda x: x.reshape(-1, h)
    c1f, c2f, p1f, p2f = flat(c1), flat(c2), flat(p1), flat(p2)
    n = c1f.shape[0]

    if use_pallas is None:
        total_bytes = sum(int(x.size) * jnp.dtype(x.dtype).itemsize
                          for x in (c1f, c2f, p1f, p2f))
        # Below ~256 KiB total traffic the custom-call launch dominates.
        use_pallas = total_bytes >= (256 * 1024)

    if use_pallas:
        loss = _pallas_loss(c1f, c2f, p1f, p2f, counter_loss, tile_rows)
    else:
        loss, _ = _reference(c1f, c2f, p1f, p2f, counter_loss)

    acc = loss * 0.0
    return loss, acc


# -----------------------------------------------------------------------------
# Pure-JAX reference (mirrors torch.nn.functional.cosine_similarity)
# -----------------------------------------------------------------------------
def _row_cosine_ref(a, b):
    a = a.astype(jnp.float32)
    b = b.astype(jnp.float32)
    dot = jnp.sum(a * b, axis=-1)
    na2 = jnp.sum(a * a, axis=-1)
    nb2 = jnp.sum(b * b, axis=-1)
    return dot / jnp.maximum(jnp.sqrt(na2 * nb2), _EPS)


def _reference(c1, c2, p1, p2, counter_loss=False):
    loss = jnp.mean(1.0 - _row_cosine_ref(c1, p1))
    loss = loss + jnp.mean(1.0 - _row_cosine_ref(c2, p2))
    if counter_loss:
        loss = loss + jnp.mean(_row_cosine_ref(c1, p2)) / 2.0
        loss = loss + jnp.mean(_row_cosine_ref(c2, p1)) / 2.0
    loss = loss / 2.0
    return loss, loss * 0.0


# -----------------------------------------------------------------------------
# Self-test
# -----------------------------------------------------------------------------
if __name__ == "__main__":
    batch, seq, hidden = 2, 8, 32
    key = jax.random.PRNGKey(0)
    k1, k2, k3, k4 = jax.random.split(key, 4)

    c1 = jax.random.normal(k1, (batch, seq, hidden), jnp.float32)
    c2 = jax.random.normal(k2, (batch, seq, hidden), jnp.float32)
    p1 = jax.random.normal(k3, (batch, seq, hidden), jnp.float32)
    p2 = jax.random.normal(k4, (batch, seq, hidden), jnp.float32)

    flat = lambda x: x.reshape(-1, hidden)

    # 1) base path (single block, no mask, force the Pallas kernel).
    loss, acc = loss_style_similarity(c1, c2, p1, p2, counter_loss=False,
                                      use_pallas=True)
    jax.block_until_ready((loss, acc))
    ref_loss, _ = _reference(flat(c1), flat(c2), flat(p1), flat(p2), False)
    assert jnp.allclose(loss, ref_loss, atol=1e-5, rtol=1e-5), (loss, ref_loss)
    assert float(acc) == 0.0

    # 2) counter_loss path + 2-core row split (tile_rows=8 -> grid=(2, 1)).
    loss_c, acc_c = loss_style_similarity(c1, c2, p1, p2, counter_loss=True,
                                          tile_rows=8, use_pallas=True)
    jax.block_until_ready((loss_c, acc_c))
    ref_c, _ = _reference(flat(c1), flat(c2), flat(p1), flat(p2), True)
    assert jnp.allclose(loss_c, ref_c, atol=1e-5, rtol=1e-5), (loss_c, ref_c)

    # 3) N not a multiple of the tile: ragged last block masked in-kernel.
    kk = jax.random.split(jax.random.PRNGKey(1), 4)
    xs = [jax.random.normal(k, (3, 10, hidden), jnp.float32) for k in kk]
    loss_p, _ = loss_style_similarity(*xs, counter_loss=True, tile_rows=8,
                                      use_pallas=True)
    jax.block_until_ready(loss_p)
    ref_p, _ = _reference(*[x.reshape(-1, hidden) for x in xs], True)
    assert jnp.allclose(loss_p, ref_p, atol=1e-5, rtol=1e-5), (loss_p, ref_p)

    # 4) odd block count: clamped duplicate block is fully masked.
    kk2 = jax.random.split(jax.random.PRNGKey(2), 4)
    ys = [jax.random.normal(k, (5, 8, hidden), jnp.float32) for k in kk2]
    loss_o, _ = loss_style_similarity(*ys, counter_loss=False, tile_rows=8,
                                      use_pallas=True)
    jax.block_until_ready(loss_o)
    ref_o, _ = _reference(*[y.reshape(-1, hidden) for y in ys], False)
    assert jnp.allclose(loss_o, ref_o, atol=1e-5, rtol=1e-5), (loss_o, ref_o)

    # 5) mixed dtypes: bf16 par streams stay bf16 over HBM, f32 in-register.
    xs_mixed = [xs[0], xs[1],
                xs[2].astype(jnp.bfloat16), xs[3].astype(jnp.bfloat16)]
    loss_m, _ = loss_style_similarity(*xs_mixed, counter_loss=True,
                                      tile_rows=8, use_pallas=True)
    jax.block_until_ready(loss_m)
    ref_m, _ = _reference(*[x.reshape(-1, hidden) for x in xs_mixed], True)
    assert jnp.allclose(loss_m, ref_m, atol=1e-4, rtol=1e-4), (loss_m, ref_m)

    print("KERNEL_OK")
</pallas_src>

<mosaic_0001>
module attributes {stable_mosaic.version = 11 : i64} {
  func.func @_style_similarity_kernel(%arg0: i32, %arg1: i32, %arg2: memref<16x32xf32, #tpu.memory_space<vmem>>, %arg3: memref<16x32xf32, #tpu.memory_space<vmem>>, %arg4: memref<16x32xf32, #tpu.memory_space<vmem>>, %arg5: memref<16x32xf32, #tpu.memory_space<vmem>>, %arg6: memref<1x8x128xf32, #tpu.memory_space<vmem>>, %arg7: memref<16x1xf32, #tpu.memory_space<vmem>>) attributes {dimension_semantics = [#tpu.dimension_semantics<parallel>, #tpu.dimension_semantics<arbitrary>], iteration_bounds = array<i64: 1, 1>, scalar_prefetch = 0 : i64, scratch_operands = 1 : i64, tpu.core_type = #tpu.core_type<tc>, window_params = [{transform_indices = @transform_0, window_bounds = array<i64: 16, 32>}, {transform_indices = @transform_1, window_bounds = array<i64: 16, 32>}, {transform_indices = @transform_2, window_bounds = array<i64: 16, 32>}, {transform_indices = @transform_3, window_bounds = array<i64: 16, 32>}, {transform_indices = @transform_4, window_bounds = array<i64: 1, 8, 128>}]} {
    %c0_i32 = arith.constant 0 : i32
    %0 = arith.cmpi eq, %arg1, %c0_i32 : i32
    %1 = arith.extui %0 : i1 to i32
    %c0_i32_0 = arith.constant 0 : i32
    %2 = arith.cmpi ne, %1, %c0_i32_0 : i32
    scf.if %2 {
      %cst_22 = arith.constant 0.000000e+00 : f32
      %44 = vector.broadcast %cst_22 : f32 to vector<16x1xf32>
      %c0_23 = arith.constant 0 : index
      %c0_24 = arith.constant 0 : index
      %45 = vector.load %arg7[%c0_23, %c0_24] : memref<16x1xf32, #tpu.memory_space<vmem>>, vector<16x1xf32>
      tpu.vector_store %arg7[%c0_23, %c0_24], %44 {strides = array<i32>} : memref<16x1xf32, #tpu.memory_space<vmem>>, vector<16x1xf32>,
    } else {
    }
    %c0 = arith.constant 0 : index
    %c0_1 = arith.constant 0 : index
    %3 = vector.load %arg2[%c0, %c0_1] : memref<16x32xf32, #tpu.memory_space<vmem>>, vector<16x32xf32>
    %c0_2 = arith.constant 0 : index
    %c0_3 = arith.constant 0 : index
    %4 = vector.load %arg3[%c0_2, %c0_3] : memref<16x32xf32, #tpu.memory_space<vmem>>, vector<16x32xf32>
    %c0_4 = arith.constant 0 : index
    %c0_5 = arith.constant 0 : index
    %5 = vector.load %arg4[%c0_4, %c0_5] : memref<16x32xf32, #tpu.memory_space<vmem>>, vector<16x32xf32>
    %c0_6 = arith.constant 0 : index
    %c0_7 = arith.constant 0 : index
    %6 = vector.load %arg5[%c0_6, %c0_7] : memref<16x32xf32, #tpu.memory_space<vmem>>, vector<16x32xf32>
    %7 = arith.mulf %3, %3 : vector<16x32xf32>
    %cst = arith.constant dense<0.000000e+00> : vector<16xf32>
    %8 = vector.multi_reduction <add>, %7, %cst [1] : vector<16x32xf32> to vector<16xf32>
    %9 = vector.shape_cast %8 : vector<16xf32> to vector<16x1xf32>
    %10 = arith.mulf %4, %4 : vector<16x32xf32>
    %cst_8 = arith.constant dense<0.000000e+00> : vector<16xf32>
    %11 = vector.multi_reduction <add>, %10, %cst_8 [1] : vector<16x32xf32> to vector<16xf32>
    %12 = vector.shape_cast %11 : vector<16xf32> to vector<16x1xf32>
    %13 = arith.mulf %5, %5 : vector<16x32xf32>
    %cst_9 = arith.constant dense<0.000000e+00> : vector<16xf32>
    %14 = vector.multi_reduction <add>, %13, %cst_9 [1] : vector<16x32xf32> to vector<16xf32>
    %15 = vector.shape_cast %14 : vector<16xf32> to vector<16x1xf32>
    %16 = arith.mulf %6, %6 : vector<16x32xf32>
    %cst_10 = arith.constant dense<0.000000e+00> : vector<16xf32>
    %17 = vector.multi_reduction <add>, %16, %cst_10 [1] : vector<16x32xf32> to vector<16xf32>
    %18 = vector.shape_cast %17 : vector<16xf32> to vector<16x1xf32>
    %19 = arith.mulf %3, %5 : vector<16x32xf32>
    %cst_11 = arith.constant dense<0.000000e+00> : vector<16xf32>
    %20 = vector.multi_reduction <add>, %19, %cst_11 [1] : vector<16x32xf32> to vector<16xf32>
    %21 = vector.shape_cast %20 : vector<16xf32> to vector<16x1xf32>
    %22 = arith.mulf %9, %15 : vector<16x1xf32>
    %cst_12 = arith.constant 1.000000e-16 : f32
    %23 = vector.broadcast %cst_12 : f32 to vector<16x1xf32>
    %24 = arith.maximumf %22, %23 : vector<16x1xf32>
    %25 = math.rsqrt %24 : vector<16x1xf32>
    %26 = arith.mulf %21, %25 : vector<16x1xf32>
    %cst_13 = arith.constant 0.000000e+00 : f32
    %27 = vector.broadcast %cst_13 : f32 to vector<16x1xf32>
    %28 = arith.subf %27, %26 : vector<16x1xf32>
    %29 = arith.mulf %4, %6 : vector<16x32xf32>
    %cst_14 = arith.constant dense<0.000000e+00> : vector<16xf32>
    %30 = vector.multi_reduction <add>, %29, %cst_14 [1] : vector<16x32xf32> to vector<16xf32>
    %31 = vector.shape_cast %30 : vector<16xf32> to vector<16x1xf32>
    %32 = arith.mulf %12, %18 : vector<16x1xf32>
    %cst_15 = arith.constant 1.000000e-16 : f32
    %33 = vector.broadcast %cst_15 : f32 to vector<16x1xf32>
    %34 = arith.maximumf %32, %33 : vector<16x1xf32>
    %35 = math.rsqrt %34 : vector<16x1xf32>
    %36 = arith.mulf %31, %35 : vector<16x1xf32>
    %37 = arith.subf %28, %36 : vector<16x1xf32>
    %c0_16 = arith.constant 0 : index
    %c0_17 = arith.constant 0 : index
    %38 = vector.load %arg7[%c0_16, %c0_17] : memref<16x1xf32, #tpu.memory_space<vmem>>, vector<16x1xf32>
    %39 = arith.addf %38, %37 : vector<16x1xf32>
    %c0_18 = arith.constant 0 : index
    %c0_19 = arith.constant 0 : index
    %40 = vector.load %arg7[%c0_18, %c0_19] : memref<16x1xf32, #tpu.memory_space<vmem>>, vector<16x1xf32>
    tpu.vector_store %arg7[%c0_18, %c0_19], %39 {strides = array<i32>} : memref<16x1xf32, #tpu.memory_space<vmem>>, vector<16x1xf32>,
    %c0_i32_20 = arith.constant 0 : i32
    %41 = arith.cmpi eq, %arg1, %c0_i32_20 : i32
    %42 = arith.extui %41 : i1 to i32
    %c0_i32_21 = arith.constant 0 : i32
    %43 = arith.cmpi ne, %42, %c0_i32_21 : i32
    scf.if %43 {
      %c0_22 = arith.constant 0 : index
      %c0_23 = arith.constant 0 : index
      %44 = vector.load %arg7[%c0_22, %c0_23] : memref<16x1xf32, #tpu.memory_space<vmem>>, vector<16x1xf32>
      %45 = vector.shape_cast %44 : vector<16x1xf32> to vector<1x16x1xf32>
      %cst_24 = arith.constant dense<0.000000e+00> : vector<1xf32>
      %46 = vector.multi_reduction <add>, %45, %cst_24 [1, 2] : vector<1x16x1xf32> to vector<1xf32>
      %47 = vector.shape_cast %46 : vector<1xf32> to vector<1x1x1xf32>
      %48 = vector.extract %47[0, 0, 0] : f32 from vector<1x1x1xf32>
      %49 = vector.broadcast %48 : f32 to vector<1x8x128xf32>
      %c0_25 = arith.constant 0 : index
      %c0_26 = arith.constant 0 : index
      %c0_27 = arith.constant 0 : index
      %50 = vector.load %arg6[%c0_25, %c0_26, %c0_27] : memref<1x8x128xf32, #tpu.memory_space<vmem>>, vector<1x8x128xf32>
      tpu.vector_store %arg6[%c0_25, %c0_26, %c0_27], %49 {strides = array<i32>} : memref<1x8x128xf32, #tpu.memory_space<vmem>>, vector<1x8x128xf32>,
    } else {
    }
    return
  }
  func.func @transform_0(%arg0: i32, %arg1: i32) -> (i32, i32) {
    %c1_i32 = arith.constant 1 : i32
    %0 = arith.muli %arg0, %c1_i32 : i32
    %1 = arith.addi %0, %arg1 : i32
    %c0_i32 = arith.constant 0 : i32
    %2 = arith.minsi %1, %c0_i32 : i32
    %c0_i32_0 = arith.constant 0 : i32
    %c0_i32_1 = arith.constant 0 : i32
    return %2, %c0_i32_0 : i32, i32
  }
  func.func @transform_1(%arg0: i32, %arg1: i32) -> (i32, i32) {
    %c1_i32 = arith.constant 1 : i32
    %0 = arith.muli %arg0, %c1_i32 : i32
    %1 = arith.addi %0, %arg1 : i32
    %c0_i32 = arith.constant 0 : i32
    %2 = arith.minsi %1, %c0_i32 : i32
    %c0_i32_0 = arith.constant 0 : i32
    %c0_i32_1 = arith.constant 0 : i32
    return %2, %c0_i32_0 : i32, i32
  }
  func.func @transform_2(%arg0: i32, %arg1: i32) -> (i32, i32) {
    %c1_i32 = arith.constant 1 : i32
    %0 = arith.muli %arg0, %c1_i32 : i32
    %1 = arith.addi %0, %arg1 : i32
    %c0_i32 = arith.constant 0 : i32
    %2 = arith.minsi %1, %c0_i32 : i32
    %c0_i32_0 = arith.constant 0 : i32
    %c0_i32_1 = arith.constant 0 : i32
    return %2, %c0_i32_0 : i32, i32
  }
  func.func @transform_3(%arg0: i32, %arg1: i32) -> (i32, i32) {
    %c1_i32 = arith.constant 1 : i32
    %0 = arith.muli %arg0, %c1_i32 : i32
    %1 = arith.addi %0, %arg1 : i32
    %c0_i32 = arith.constant 0 : i32
    %2 = arith.minsi %1, %c0_i32 : i32
    %c0_i32_0 = arith.constant 0 : i32
    %c0_i32_1 = arith.constant 0 : i32
    return %2, %c0_i32_0 : i32, i32
  }
  func.func @transform_4(%arg0: i32, %arg1: i32) -> (i32, i32, i32) {
    %c0_i32 = arith.constant 0 : i32
    %c0_i32_0 = arith.constant 0 : i32
    %c0_i32_1 = arith.constant 0 : i32
    return %arg0, %c0_i32, %c0_i32_0 : i32, i32, i32
  }
}

</mosaic_0001>

<bundles_post_ra>
// kernel: tpu_custom_call.1
= control target key start
LH: loop header
LB: loop body
LE: loop exit
PB: predicated region body
PF: predicated region fallthrough
CT: control target
= control target key end

     0   :  { %9 = vsyncpa [#allocation4], 0  ;;  %s506_s0 = inlined_call_operand.hbm [shape: f32[16,32], index: 0, kind: input, shape index: {}]   ;;  %s507_s1 = inlined_call_operand.hbm [shape: f32[16,32], index: 1, kind: input, shape index: {}]   ;;  %s508_s2 = inlined_call_operand.hbm [shape: f32[16,32], index: 2, kind: input, shape index: {}]   ;;  %s509_s3 = inlined_call_operand.hbm [shape: f32[16,32], index: 3, kind: input, shape index: {}]   ;;  %s510_s4 = inlined_call_operand.hbm [shape: f32[1,8,128], index: 4, kind: output, shape index: {}]  }
   0x1   :  { %10 = vsyncpa [#allocation7], 0 }
   0x2   :  { %11 = vsyncpa [#allocation10], 0 }
   0x3   :  { %12 = vsyncpa [#allocation5], 0  ;;  %s42_s17 = sshll.u32 %s507_s1, 4  ;;  %s440_s18 = smov [#allocation6]   ;;  %s43_s17 = int_to_ptr.hbm [resolvable:$true] %s42_s17 }
   0x4   :  { %s44_s19 = sshll.u32 %s440_s18, 4  ;;  %s23_s22 = sshll.u32 %s506_s0, 4  ;;  %s45_s19 = int_to_ptr.vmem [resolvable:$true] %s44_s19  ;;  %s24_s22 = int_to_ptr.hbm [resolvable:$true] %s23_s22 }
   0x5   :  { %s441_s23 = smov 128   ;;  %s442_s24 = smov 8  }
   0x6   :  { %50 = dma.hbm_to_vmem [thread:$0]  %s43_s17, 256, %s45_s19, [#allocation7], %s441_s23, %s441_s23, %s442_s24  }
   0x7   :  { %s443_s25 = smov [#allocation3]   ;;  %s61_s29 = sshll.u32 %s508_s2, 4  ;;  %s62_s29 = int_to_ptr.hbm [resolvable:$true] %s61_s29 }
   0x8   :  { %s25_s26 = sshll.u32 %s443_s25, 4  ;;  %s80_s5 = sshll.u32 %s509_s3, 4  ;;  %s26_s26 = int_to_ptr.vmem [resolvable:$true] %s25_s26  ;;  %s81_s5 = int_to_ptr.hbm [resolvable:$true] %s80_s5 }
   0x9   :  { %31 = dma.hbm_to_vmem [thread:$0]  %s24_s22, 256, %s26_s26, [#allocation4], %s441_s23, %s441_s23, %s442_s24  }
   0xa   :  { %s444_s6 = smov [#allocation8]   ;;  %s445_s0 = smov [#allocation9]  }
   0xb   :  { %s63_s7 = sshll.u32 %s444_s6, 4  ;;  %s82_s8 = sshll.u32 %s445_s0, 4  ;;  %s64_s7 = int_to_ptr.vmem [resolvable:$true] %s63_s7  ;;  %s83_s8 = int_to_ptr.vmem [resolvable:$true] %s82_s8 }
   0xc   :  { %69 = dma.hbm_to_vmem [thread:$0]  %s62_s29, 256, %s64_s7, [#allocation7], %s441_s23, %s441_s23, %s442_s24  }
   0xd   :  { %88 = dma.hbm_to_vmem [thread:$0]  %s81_s5, 256, %s83_s8, [#allocation10], %s441_s23, %s441_s23, %s442_s24  }
   0xe   :  { %432 = dma.done.wait [#allocation4], 256  }
   0xf   :  { %433 = vsyncadd [#allocation4], 4294967040 }
  0x10   :  { %434 = dma.done.wait [#allocation7], 512  }
  0x11   :  { %435 = vsyncadd [#allocation7], 4294966784 }
  0x12   :  { %436 = dma.done.wait [#allocation10], 256  }
  0x13   :  { %437 = vsyncadd [#allocation10], 4294967040  ;;  %v132_v0 = vld [vmem:[#allocation8] sm:$0xff]  ;;  %vm138_vm0 = vcmask 261120   ;;  %v130_v2 = vld [vmem:[#allocation6] sm:$0xff]  ;;  %vm125_vm1 = vcmask 7168  }
  0x14   :  { %v128_v1 = vld [vmem:[#allocation3] sm:$0xff]  ;;  %v153_v3 = vmul.f32 %v132_v0, %v132_v0  ;;  %v145_v5 = vmul.f32 %v130_v2, %v130_v2  ;;  %v133_v6 = vld [vmem:[#allocation8 + $0x8] sm:$0xff]  ;;  %v131_v11 = vld [vmem:[#allocation6 + $0x8] sm:$0xff]  ;;  %v446_v35 = vmov 0.0   ;;  %s447_s2 = smov [#allocation11]   ;;  %s274_s11 = sshll.u32 %s510_s4, 4  ;;  %s275_s11 = int_to_ptr.hbm [resolvable:$true] %s274_s11 }
  0x15   :  { %v136_v4 = vmul.f32 %v128_v1, %v128_v1  ;;  %v129_v7 = vld [vmem:[#allocation3 + $0x8] sm:$0xff]  ;;  %v154_v12 = vmul.f32 %v133_v6, %v133_v6  ;;  %v146_v14 = vmul.f32 %v131_v11, %v131_v11  ;;  %v135_v18 = vld [vmem:[#allocation9 + $0x8] sm:$0xff]  ;;  %v134_v19 = vld [vmem:[#allocation9] sm:$0xff]  ;;  %v169_v22 = vmul.f32 %v132_v0, %v128_v1  ;;  %126 = vst.msk [vmem:[#allocation2] sm:$0xff] %vm125_vm1, %v446_v35  ;;  %s272_s3 = sshll.u32 %s447_s2, 4  ;;  %s273_s3 = int_to_ptr.vmem [resolvable:$true] %s272_s3 }
  0x16   :  { %v155_v8 = vsel %vm138_vm0, %v153_v3, 0.0  ;;  %v147_v10 = vsel %vm138_vm0, %v145_v5, 0.0  ;;  %v137_v13 = vmul.f32 %v129_v7, %v129_v7  ;;  %v162_v20 = vmul.f32 %v135_v18, %v135_v18  ;;  %127 = vst.msk [vmem:[#allocation2 + $0x8] sm:$0xff] %vm125_vm1, %v446_v35 }
  0x17   :  { %v139_v9 = vsel %vm138_vm0, %v136_v4, 0.0  ;;  %156 = vadd.xlane.f32.xlu1 %v155_v8  ;;  %148 = vadd.xlane.f32.xlu2 %v147_v10  ;;  %v158_v15 = vsel %vm138_vm0, %v154_v12, 0.0  ;;  %v150_v17 = vsel %vm138_vm0, %v146_v14, 0.0  ;;  %v161_v21 = vmul.f32 %v134_v19, %v134_v19 }
  0x18   :  { %140 = vadd.xlane.f32.xlu0 %v139_v9  ;;  %v142_v16 = vsel %vm138_vm0, %v137_v13, 0.0  ;;  %v166_v23 = vsel %vm138_vm0, %v162_v20, 0.0  ;;  %v171_v25 = vsel %vm138_vm0, %v169_v22, 0.0  ;;  %v170_v26 = vmul.f32 %v133_v6, %v129_v7 }
  0x19   :  { %v163_v24 = vsel %vm138_vm0, %v161_v21, 0.0  ;;  %v205_v27 = vmul.f32 %v134_v19, %v130_v2  ;;  %v206_v28 = vmul.f32 %v135_v18, %v131_v11 }
  0x1a   :  { %v174_v29 = vsel %vm138_vm0, %v170_v26, 0.0 }
  0x1b   :  { %v207_v30 = vsel %vm138_vm0, %v205_v27, 0.0  ;;  %v210_v31 = vsel %vm138_vm0, %v206_v28, 0.0 }
  0x1f   :  { %159 = vadd.xlane.f32.xlu1 %v158_v15  ;;  %151 = vadd.xlane.f32.xlu2 %v150_v17 }
  0x20   :  { %143 = vadd.xlane.f32.xlu0 %v142_v16 }
  0x27   :  { %167 = vadd.xlane.f32.xlu1 %v166_v23  ;;  %172 = vadd.xlane.f32.xlu2 %v171_v25  ;;  %v242_v23 = vld [vmem:[#allocation2 + $0x8] sm:$0xff] }
  0x28   :  { %164 = vadd.xlane.f32.xlu0 %v163_v24  ;;  %v241_v24 = vld [vmem:[#allocation2] sm:$0xff] }
  0x2f   :  { %208 = vadd.xlane.f32.xlu1 %v207_v30  ;;  %211 = vadd.xlane.f32.xlu2 %v210_v31 }
  0x30   :  { %175 = vadd.xlane.f32.xlu0 %v174_v29 }
  0x8a   :  { %v157_v32 = vpop.xlane.xlu1 %156  ;;  %v149_v37 = vpop.xlane.xlu2 %148 }
  0x8b   :  { %v141_v33 = vpop.xlane.xlu0 %140 }
  0x8c   :  { %v177_v34 = vmul.f32 %v157_v32, %v141_v33 }
  0x8e   :  { %v179_v36 = vmax.f32 %v177_v34, 1e-16 }
  0x90   :  { %304 = vrsqrt.f32 %v179_v36  ;;  %vm187_vm5 = vweird.f32 %v179_v36 }
  0x92   :  { %v160_v38 = vpop.xlane.xlu1 %159  ;;  %v152_v44 = vpop.xlane.xlu2 %151 }
  0x93   :  { %v144_v39 = vpop.xlane.xlu0 %143 }
  0x94   :  { %v178_v40 = vmul.f32 %v160_v38, %v144_v39 }
  0x96   :  { %v305_v41 = vpop.eup %304  ;;  %v180_v42 = vmax.f32 %v178_v40, 1e-16 }
  0x97   :  { %v182_v43 = vmul.f32 %v305_v41, %v179_v36  ;;  %vm188_vm3 = vweird.f32 %v305_v41 }
  0x98   :  { %306 = vrsqrt.f32 %v180_v42  ;;  %vm197_vm4 = vweird.f32 %v180_v42  ;;  %vm189_vm7 = vmor %vm187_vm5, %vm188_vm3 }
  0x99   :  { %v183_v47 = vmul.f32 %v305_v41, %v182_v43 }
  0x9a   :  { %v168_v45 = vpop.xlane.xlu1 %167  ;;  %v173_v62 = vpop.xlane.xlu2 %172 }
  0x9b   :  { %v165_v46 = vpop.xlane.xlu0 %164  ;;  %v214_v48 = vmul.f32 %v168_v45, %v152_v44  ;;  %v184_v54 = vmul.f32 0.5, %v183_v47 }
  0x9c   :  { %v213_v49 = vmul.f32 %v165_v46, %v149_v37 }
  0x9d   :  { %v216_v51 = vmax.f32 %v214_v48, 1e-16  ;;  %v185_v57 = vsub.f32 1.5, %v184_v54 }
  0x9e   :  { %v307_v50 = vpop.eup %306  ;;  %v215_v52 = vmax.f32 %v213_v49, 1e-16 }
  0x9f   :  { %v192_v53 = vmul.f32 %v307_v50, %v180_v42  ;;  %308 = vrsqrt.f32 %v216_v51  ;;  %vm198_vm2 = vweird.f32 %v307_v50  ;;  %v186_v1 = vmul.f32 %v305_v41, %v185_v57 }
  0xa0   :  { %310 = vrsqrt.f32 %v215_v52  ;;  %vm199_vm6 = vmor %vm197_vm4, %vm198_vm2  ;;  %vm233_vm10 = vweird.f32 %v216_v51  ;;  %vm223_vm11 = vweird.f32 %v215_v52 }
  0xa1   :  { %v193_v55 = vmul.f32 %v307_v50, %v192_v53  ;;  %v190_v8 = vsel %vm189_vm7, %v305_v41, %v186_v1 }
  0xa2   :  { %v201_v12 = vmul.f32 %v190_v8, %v173_v62  ;;  %v212_v14 = vpop.xlane.xlu2 %211  ;;  %v209_v15 = vpop.xlane.xlu1 %208 }
  0xa3   :  { %v194_v56 = vmul.f32 0.5, %v193_v55  ;;  %v176_v6 = vpop.xlane.xlu0 %175 }
  0xa4   :  { %v203_v21 = vsub.f32 0.0, %v201_v12 }
  0xa5   :  { %v195_v58 = vsub.f32 1.5, %v194_v56  ;;  %v309_v59 = vpop.eup %308 }
  0xa6   :  { %v311_v60 = vpop.eup %310  ;;  %v228_v61 = vmul.f32 %v309_v59, %v216_v51  ;;  %vm234_vm8 = vweird.f32 %v309_v59 }
  0xa7   :  { %v196_v63 = vmul.f32 %v307_v50, %v195_v58  ;;  %v218_v0 = vmul.f32 %v311_v60, %v215_v52  ;;  %vm224_vm9 = vweird.f32 %v311_v60  ;;  %vm235_vm12 = vmor %vm233_vm10, %vm234_vm8 }
  0xa8   :  { %v229_v2 = vmul.f32 %v309_v59, %v228_v61  ;;  %vm225_vm13 = vmor %vm223_vm11, %vm224_vm9 }
  0xa9   :  { %v219_v3 = vmul.f32 %v311_v60, %v218_v0  ;;  %v200_v5 = vsel %vm199_vm6, %v307_v50, %v196_v63 }
  0xaa   :  { %v230_v4 = vmul.f32 0.5, %v229_v2  ;;  %v202_v10 = vmul.f32 %v200_v5, %v176_v6 }
  0xab   :  { %v220_v7 = vmul.f32 0.5, %v219_v3 }
  0xac   :  { %v231_v9 = vsub.f32 1.5, %v230_v4  ;;  %v204_v18 = vsub.f32 0.0, %v202_v10 }
  0xad   :  { %v221_v11 = vsub.f32 1.5, %v220_v7 }
  0xae   :  { %v232_v13 = vmul.f32 %v309_v59, %v231_v9 }
  0xaf   :  { %v222_v16 = vmul.f32 %v311_v60, %v221_v11 }
  0xb0   :  { %v236_v17 = vsel %vm235_vm12, %v309_v59, %v232_v13 }
  0xb1   :  { %v226_v19 = vsel %vm225_vm13, %v311_v60, %v222_v16  ;;  %v238_v20 = vmul.f32 %v236_v17, %v212_v14 }
  0xb2   :  { %v237_v22 = vmul.f32 %v226_v19, %v209_v15 }
  0xb3   :  { %v240_v25 = vsub.f32 %v204_v18, %v238_v20 }
  0xb4   :  { %v239_v26 = vsub.f32 %v203_v21, %v237_v22 }
  0xb5   :  { %v244_v27 = vadd.f32 %v242_v23, %v240_v25 }
  0xb6   :  { %v243_v28 = vadd.f32 %v241_v24, %v239_v26 }
  0xb7   :  { %247 = vst.msk [vmem:[#allocation2 + $0x8] sm:$0xff] %vm125_vm1, %v244_v27 }
  0xb8   :  { %246 = vst.msk [vmem:[#allocation2] sm:$0xff] %vm125_vm1, %v243_v28 }
  0xbe   :  { %v252_v29 = vld [vmem:[#allocation2 + $0x8] sm:$0xff] }
  0xbf   :  { %v251_v30 = vld [vmem:[#allocation2] sm:$0xff]  ;;  %v254_v31 = vsel %vm125_vm1, %v252_v29, 0.0 }
  0xc0   :  { %v253_v32 = vsel %vm125_vm1, %v251_v30, 0.0 }
  0xc1   :  { %v255_v33 = vadd.f32 %v254_v31, %v253_v32 }
  0xc3   :  { %256 = vadd.xlane.f32.xlu0 %v255_v33 }
 0x136   :  { %v257_v34 = vpop.xlane.xlu0 %256 }
 0x137   :  { %v258_v35 = vrot.slane %v257_v34, 4 }
 0x139   :  { %v259_v36 = vadd.f32 %v258_v35, %v257_v34 }
 0x13b   :  { %v260_v37 = vrot.slane %v259_v36, 2 }
 0x13d   :  { %v261_v38 = vadd.f32 %v260_v37, %v259_v36 }
 0x13f   :  { %v262_v39 = vrot.slane %v261_v38, 1 }
 0x141   :  { %v263_v40 = vadd.f32 %v262_v39, %v261_v38 }
 0x143   :  { %294 = vpush %v263_v40 }
 0x174   :  { %s295_s12 = spop %294 }
 0x175   :  { %v265_v41 = vstv %s295_s12 }
 0x176   :  { %266 = vst [vmem:[#allocation11] sm:$0xff] %v265_v41 }
 0x177   :  { %277 = dma.vmem_to_hbm [thread:$0]  %s273_s3, 128, %s275_s11, [#allocation5]  }
 0x178   :  { %438 = dma.done.wait [#allocation5], 128  }
 0x179   :  { %439 = vsyncadd [#allocation5], 4294967168 }
 0x17a   :  { %282 = vsyncpa [#allocation4], 1 }
 0x17b   :  { %283 = vsyncpa [#allocation7], 1 }
 0x17c   :  { %284 = vsyncpa [#allocation10], 1 }
 0x17d   :  { %285 = vsyncpa [#allocation5], 1 }

</bundles_post_ra>
